<compile_context>
chip_gen: v6e
topology: v6e:2x2x1
jax: 0.10.0
libtpu: 0.0.40
codegen_flags: <defaults>
</compile_context>

<pallas_src>
import functools

import jax
import jax.numpy as jnp
from jax.experimental import pallas as pl
from jax.experimental.pallas import tpu as pltpu


def _round_up(v, m):
    return ((v + m - 1) // m) * m


# ----------------------------------------------------------------------------
# Fused cv1 + cv2 kernel body (all shape parameters are static / closed over)
# ----------------------------------------------------------------------------
def _make_fused_kernel(h, w, c1, c_mid, c2, c1p, cmp_, add):
    hw = h * w
    pad = _round_up(w + 1, 128)  # lane-aligned zero margin >= max |tap offset|

    def stage_and_build_slab(buf, slab, src, cin, cinp, m_ref):
        # buf:  (cin, hw + 2*pad) staging buffer; zero margins give the "rows
        #       outside the image" zeros of a 'same' conv for free.
        # slab: (9*cinp, hw) im2col slab, per-tap rows at 8-aligned offsets.
        buf[:, :pad] = jnp.zeros((cin, pad), buf.dtype)
        buf[:, pad + hw:] = jnp.zeros((cin, pad), buf.dtype)
        buf[:, pad:pad + hw] = src
        if cinp != cin:
            # Zero the unused K-padding rows (their weight columns are zero,
            # but uninitialised VMEM could hold NaNs).
            slab[...] = jnp.zeros_like(slab)
        for k in range(9):                       # unrolled, static offsets
            dy, dx = divmod(k, 3)
            off = (dy - 1) * w + (dx - 1)
            v = buf[:, pad + off: pad + off + hw]
            if dx == 0:      # tap reads column b-1 -> invalid at b == 0
                v = v * m_ref[0:1, :]
            elif dx == 2:    # tap reads column b+1 -> invalid at b == W-1
                v = v * m_ref[1:2, :]
            slab[k * cinp: k * cinp + cin, :] = v

    def kernel(x_ref, m_ref, w1_ref, b1_ref, w2_ref, b2_ref, o_ref,
               buf1, slab1, buf2, slab2):
        # ---- cv1: 3x3 conv as a single GEMM + folded-BN shift + SiLU --------
        stage_and_build_slab(buf1, slab1, x_ref[...], c1, c1p, m_ref)
        hid = jnp.dot(w1_ref[...], slab1[...],
                      preferred_element_type=jnp.float32)
        hid = hid + b1_ref[...]
        hid = hid * jax.nn.sigmoid(hid)                     # SiLU (f32, v5e-safe)
        # ---- cv2: 3x3 conv as a single GEMM + shift + SiLU (+ residual) -----
        stage_and_build_slab(buf2, slab2, hid.astype(buf2.dtype),
                             c_mid, cmp_, m_ref)
        y = jnp.dot(w2_ref[...], slab2[...],
                    preferred_element_type=jnp.float32)
        y = y + b2_ref[...]
        y = y * jax.nn.sigmoid(y)
        if add:
            y = y + x_ref[...].astype(jnp.float32)          # fused residual add
        o_ref[...] = y.astype(o_ref.dtype)

    return kernel


# ----------------------------------------------------------------------------
# Wrapper: BN folding, weight packing, masks, specs
# ----------------------------------------------------------------------------
def _fold_bn(wk, gamma, beta, mean, var, eps):
    scale = gamma / jnp.sqrt(var + eps)
    shift = beta - mean * scale
    wf = wk.astype(jnp.float32) * scale[:, None, None, None].astype(jnp.float32)
    return wf, shift.astype(jnp.float32)


def _pack_weight(wf, cin, cinp, dtype):
    """(Cout, Cin, 3, 3) -> (Cout, 9*cinp) matching the slab's per-tap row order."""
    cout = wf.shape[0]
    wt = jnp.transpose(wf, (0, 2, 3, 1)).reshape(cout, 9, cin)  # [o, k=dy*3+dx, c]
    wt = jnp.pad(wt, ((0, 0), (0, 0), (0, cinp - cin)))
    return wt.reshape(cout, 9 * cinp).astype(dtype)


def bottleneck_condconv(x, w1, bn1, w2, bn2, shortcut=True, eps=1e-5,
                        compute_dtype=None):
    """Fused Bottleneck_CondConv forward.

    x: (N, C1, H, W); w1: (C_, C1, 3, 3); w2: (C2, C_, 3, 3);
    bn1/bn2 = (gamma, beta, running_mean, running_var).
    compute_dtype: storage / MXU-operand dtype inside the kernel (None -> x.dtype;
    jnp.bfloat16 halves HBM traffic and doubles MXU rate; accumulation stays f32).
    """
    n, c1, h, w = x.shape
    c_mid, c2 = w1.shape[0], w2.shape[0]
    assert w1.shape == (c_mid, c1, 3, 3) and w2.shape == (c2, c_mid, 3, 3)
    hw = h * w
    add = bool(shortcut) and (c1 == c2)
    out_dtype = x.dtype
    cdt = jnp.dtype(compute_dtype) if compute_dtype is not None else jnp.dtype(x.dtype)

    c1p = _round_up(c1, 8)
    cmp_ = _round_up(c_mid, 8)

    w1f, b1 = _fold_bn(w1, *bn1, eps)
    w2f, b2 = _fold_bn(w2, *bn2, eps)
    w1m = _pack_weight(w1f, c1, c1p, cdt)
    w2m = _pack_weight(w2f, c_mid, cmp_, cdt)
    b1 = b1.reshape(c_mid, 1)
    b2 = b2.reshape(c2, 1)

    # Column-edge masks for the dx=0 / dx=2 taps (row edges are handled by the
    # zero margins of the staging buffer).
    col = jnp.arange(hw, dtype=jnp.int32) % w
    masks = jnp.stack([col != 0, col != (w - 1)]).astype(cdt)          # (2, HW)

    x_flat = x.reshape(n, c1, hw).astype(cdt)

    pad = _round_up(w + 1, 128)
    scratch_shapes = [
        pltpu.VMEM((c1, hw + 2 * pad), cdt),      # cv1 staging buffer
        pltpu.VMEM((9 * c1p, hw), cdt),           # cv1 im2col slab
        pltpu.VMEM((c_mid, hw + 2 * pad), cdt),   # cv2 staging buffer
        pltpu.VMEM((9 * cmp_, hw), cdt),          # cv2 im2col slab
    ]

    # Rough per-step VMEM estimate; only raise the scoped-VMEM limit when
    # actually needed so the same code compiles on v5e/v6e/v7x defaults.
    isz = cdt.itemsize
    est = (2 * (c1 + c2) * hw * isz                      # pipelined x / out blocks
           + (c1 + c_mid) * (hw + 2 * pad) * isz         # staging buffers
           + 9 * (c1p + cmp_) * hw * isz                 # im2col slabs
           + (w1m.size + w2m.size + masks.size) * isz
           + (c_mid + c2) * hw * 4                       # f32 GEMM outputs
           + (4 << 20))                                  # headroom
    vmem_limit = None if est <= (32 << 20) else min(int(est), 64 << 20)
    # TODO(synk): if `est` still exceeds the per-generation VMEM budget, add
    #   row-halo tiling (contiguous flattened row-tile + halo) as a second grid axis.

    kernel = _make_fused_kernel(h, w, c1, c_mid, c2, c1p, cmp_, add)

    out = pl.pallas_call(
        kernel,
        out_shape=jax.ShapeDtypeStruct((n, c2, hw), out_dtype),
        grid=(n,),
        in_specs=[
            pl.BlockSpec((None, c1, hw), lambda i: (i, 0, 0)),     # x (per sample)
            pl.BlockSpec((2, hw), lambda i: (0, 0)),               # column masks
            pl.BlockSpec((c_mid, 9 * c1p), lambda i: (0, 0)),      # cv1 weight (BN folded)
            pl.BlockSpec((c_mid, 1), lambda i: (0, 0)),            # cv1 shift
            pl.BlockSpec((c2, 9 * cmp_), lambda i: (0, 0)),        # cv2 weight (BN folded)
            pl.BlockSpec((c2, 1), lambda i: (0, 0)),               # cv2 shift
        ],
        out_specs=pl.BlockSpec((None, c2, hw), lambda i: (i, 0, 0)),
        scratch_shapes=scratch_shapes,
        compiler_params=pltpu.CompilerParams(
            dimension_semantics=("parallel",),
            vmem_limit_bytes=vmem_limit),
    )(x_flat, masks, w1m, b1, w2m, b2)
    return out.reshape(n, c2, h, w)


# ----------------------------------------------------------------------------
# Pure-JAX reference for verification
# ----------------------------------------------------------------------------
def _ref_conv_bn_silu(x, w, gamma, beta, mean, var, eps=1e-5):
    y = jax.lax.conv_general_dilated(
        x, w, window_strides=(1, 1), padding=((1, 1), (1, 1)),
        dimension_numbers=("NCHW", "OIHW", "NCHW"),
        precision=jax.lax.Precision.HIGHEST)
    scale = (gamma / jnp.sqrt(var + eps)).reshape(1, -1, 1, 1)
    shift = (beta - mean * gamma / jnp.sqrt(var + eps)).reshape(1, -1, 1, 1)
    y = y * scale + shift
    return y * jax.nn.sigmoid(y)


def bottleneck_condconv_ref(x, w1, bn1, w2, bn2, shortcut=True):
    c1, c2 = x.shape[1], w2.shape[0]
    hid = _ref_conv_bn_silu(x, w1, *bn1)
    y = _ref_conv_bn_silu(hid, w2, *bn2)
    return x + y if (shortcut and c1 == c2) else y


if __name__ == "__main__":
    key = jax.random.PRNGKey(0)
    ks = jax.random.split(key, 11)

    # Bottleneck_CondConv(c1=8, c2=8, shortcut=True, e=0.5) -> c_ = 4
    B, C1, C2, H, W = 2, 8, 8, 16, 16
    C_ = int(C2 * 0.5)

    x = jax.random.normal(ks[0], (B, C1, H, W), dtype=jnp.float32)
    w1 = jax.random.normal(ks[1], (C_, C1, 3, 3), dtype=jnp.float32) * 0.1
    bn1 = (1.0 + 0.1 * jax.random.normal(ks[2], (C_,), dtype=jnp.float32),
           0.1 * jax.random.normal(ks[3], (C_,), dtype=jnp.float32),
           0.1 * jax.random.normal(ks[4], (C_,), dtype=jnp.float32),
           0.5 + jnp.abs(jax.random.normal(ks[5], (C_,), dtype=jnp.float32)))
    w2 = jax.random.normal(ks[6], (C2, C_, 3, 3), dtype=jnp.float32) * 0.1
    bn2 = (1.0 + 0.1 * jax.random.normal(ks[7], (C2,), dtype=jnp.float32),
           0.1 * jax.random.normal(ks[8], (C2,), dtype=jnp.float32),
           0.1 * jax.random.normal(ks[9], (C2,), dtype=jnp.float32),
           0.5 + jnp.abs(jax.random.normal(ks[10], (C2,), dtype=jnp.float32)))

    ref = jax.block_until_ready(
        bottleneck_condconv_ref(x, w1, bn1, w2, bn2, shortcut=True))

    # Exact-dtype path: f32 storage / operands, f32 accumulation.
    fwd_f32 = jax.jit(functools.partial(bottleneck_condconv, shortcut=True,
                                        compute_dtype=jnp.float32))
    out_f32 = jax.block_until_ready(fwd_f32(x, w1, bn1, w2, bn2))
    assert out_f32.shape == (B, C2, H, W)
    err_f32 = float(jnp.max(jnp.abs(out_f32 - ref)))
    assert err_f32 < 2e-3, f"f32 mismatch vs reference: {err_f32}"

    # Fast path: bf16 storage / MXU operands, f32 accumulation + f32 epilogue.
    fwd_bf16 = jax.jit(functools.partial(bottleneck_condconv, shortcut=True,
                                         compute_dtype=jnp.bfloat16))
    out_bf16 = jax.block_until_ready(fwd_bf16(x, w1, bn1, w2, bn2))
    err_bf16 = float(jnp.max(jnp.abs(out_bf16.astype(jnp.float32) - ref)))
    assert err_bf16 < 1e-1, f"bf16 mismatch vs reference: {err_bf16}"

    print("KERNEL_OK")
</pallas_src>

<mosaic_0001>
module attributes {stable_mosaic.version = 11 : i64} {
  func.func @kernel(%arg0: i32, %arg1: memref<1x8x256xf32, #tpu.memory_space<vmem>>, %arg2: memref<2x256xf32, #tpu.memory_space<vmem>>, %arg3: memref<4x72xf32, #tpu.memory_space<vmem>>, %arg4: memref<4x1xf32, #tpu.memory_space<vmem>>, %arg5: memref<8x72xf32, #tpu.memory_space<vmem>>, %arg6: memref<8x1xf32, #tpu.memory_space<vmem>>, %arg7: memref<1x8x256xf32, #tpu.memory_space<vmem>>, %arg8: memref<8x512xf32, #tpu.memory_space<vmem>>, %arg9: memref<72x256xf32, #tpu.memory_space<vmem>>, %arg10: memref<4x512xf32, #tpu.memory_space<vmem>>, %arg11: memref<72x256xf32, #tpu.memory_space<vmem>>) attributes {dimension_semantics = [#tpu.dimension_semantics<parallel>], iteration_bounds = array<i64: 2>, scalar_prefetch = 0 : i64, scratch_operands = 4 : i64, tpu.core_type = #tpu.core_type<tc>, window_params = [{transform_indices = @transform_0, window_bounds = array<i64: 1, 8, 256>}, {pipeline_mode = #tpu.pipeline_mode<synchronous>, transform_indices = @transform_1, window_bounds = array<i64: 2, 256>}, {pipeline_mode = #tpu.pipeline_mode<synchronous>, transform_indices = @transform_2, window_bounds = array<i64: 4, 72>}, {pipeline_mode = #tpu.pipeline_mode<synchronous>, transform_indices = @transform_3, window_bounds = array<i64: 4, 1>}, {pipeline_mode = #tpu.pipeline_mode<synchronous>, transform_indices = @transform_4, window_bounds = array<i64: 8, 72>}, {pipeline_mode = #tpu.pipeline_mode<synchronous>, transform_indices = @transform_5, window_bounds = array<i64: 8, 1>}, {transform_indices = @transform_6, window_bounds = array<i64: 1, 8, 256>}]} {
    %c0 = arith.constant 0 : index
    %c0_0 = arith.constant 0 : index
    %c0_1 = arith.constant 0 : index
    %0 = vector.load %arg1[%c0, %c0_0, %c0_1] : memref<1x8x256xf32, #tpu.memory_space<vmem>>, vector<1x8x256xf32>
    %1 = vector.shape_cast %0 : vector<1x8x256xf32> to vector<8x256xf32>
    %cst = arith.constant 0.000000e+00 : f32
    %2 = vector.broadcast %cst : f32 to vector<8x128xf32>
    %c0_2 = arith.constant 0 : index
    %c0_3 = arith.constant 0 : index
    %3 = vector.load %arg8[%c0_2, %c0_3] : memref<8x512xf32, #tpu.memory_space<vmem>>, vector<8x128xf32>
    tpu.vector_store %arg8[%c0_2, %c0_3], %2 {strides = array<i32>} : memref<8x512xf32, #tpu.memory_space<vmem>>, vector<8x128xf32>,
    %cst_4 = arith.constant 0.000000e+00 : f32
    %4 = vector.broadcast %cst_4 : f32 to vector<8x128xf32>
    %c0_5 = arith.constant 0 : index
    %c384 = arith.constant 384 : index
    %5 = vector.load %arg8[%c0_5, %c384] : memref<8x512xf32, #tpu.memory_space<vmem>>, vector<8x128xf32>
    tpu.vector_store %arg8[%c0_5, %c384], %4 {strides = array<i32>} : memref<8x512xf32, #tpu.memory_space<vmem>>, vector<8x128xf32>,
    %c0_6 = arith.constant 0 : index
    %c128 = arith.constant 128 : index
    %6 = vector.load %arg8[%c0_6, %c128] : memref<8x512xf32, #tpu.memory_space<vmem>>, vector<8x256xf32>
    tpu.vector_store %arg8[%c0_6, %c128], %1 {strides = array<i32>} : memref<8x512xf32, #tpu.memory_space<vmem>>, vector<8x256xf32>,
    %c0_7 = arith.constant 0 : index
    %c111 = arith.constant 111 : index
    %7 = vector.load %arg8[%c0_7, %c111] : memref<8x512xf32, #tpu.memory_space<vmem>>, vector<8x256xf32>
    %c0_8 = arith.constant 0 : index
    %c0_9 = arith.constant 0 : index
    %8 = vector.load %arg2[%c0_8, %c0_9] : memref<2x256xf32, #tpu.memory_space<vmem>>, vector<1x256xf32>
    %9 = vector.broadcast %8 : vector<1x256xf32> to vector<8x256xf32>
    %10 = arith.mulf %7, %9 : vector<8x256xf32>
    %c0_10 = arith.constant 0 : index
    %c0_11 = arith.constant 0 : index
    %11 = vector.load %arg9[%c0_10, %c0_11] : memref<72x256xf32, #tpu.memory_space<vmem>>, vector<8x256xf32>
    tpu.vector_store %arg9[%c0_10, %c0_11], %10 {strides = array<i32>} : memref<72x256xf32, #tpu.memory_space<vmem>>, vector<8x256xf32>,
    %c0_12 = arith.constant 0 : index
    %c112 = arith.constant 112 : index
    %12 = vector.load %arg8[%c0_12, %c112] : memref<8x512xf32, #tpu.memory_space<vmem>>, vector<8x256xf32>
    %c8 = arith.constant 8 : index
    %c0_13 = arith.constant 0 : index
    %13 = vector.load %arg9[%c8, %c0_13] : memref<72x256xf32, #tpu.memory_space<vmem>>, vector<8x256xf32>
    tpu.vector_store %arg9[%c8, %c0_13], %12 {strides = array<i32>} : memref<72x256xf32, #tpu.memory_space<vmem>>, vector<8x256xf32>,
    %c0_14 = arith.constant 0 : index
    %c113 = arith.constant 113 : index
    %14 = vector.load %arg8[%c0_14, %c113] : memref<8x512xf32, #tpu.memory_space<vmem>>, vector<8x256xf32>
    %c1 = arith.constant 1 : index
    %c0_15 = arith.constant 0 : index
    %15 = vector.load %arg2[%c1, %c0_15] : memref<2x256xf32, #tpu.memory_space<vmem>>, vector<1x256xf32>
    %16 = vector.broadcast %15 : vector<1x256xf32> to vector<8x256xf32>
    %17 = arith.mulf %14, %16 : vector<8x256xf32>
    %c16 = arith.constant 16 : index
    %c0_16 = arith.constant 0 : index
    %18 = vector.load %arg9[%c16, %c0_16] : memref<72x256xf32, #tpu.memory_space<vmem>>, vector<8x256xf32>
    tpu.vector_store %arg9[%c16, %c0_16], %17 {strides = array<i32>} : memref<72x256xf32, #tpu.memory_space<vmem>>, vector<8x256xf32>,
    %c0_17 = arith.constant 0 : index
    %c127 = arith.constant 127 : index
    %19 = vector.load %arg8[%c0_17, %c127] : memref<8x512xf32, #tpu.memory_space<vmem>>, vector<8x256xf32>
    %c0_18 = arith.constant 0 : index
    %c0_19 = arith.constant 0 : index
    %20 = vector.load %arg2[%c0_18, %c0_19] : memref<2x256xf32, #tpu.memory_space<vmem>>, vector<1x256xf32>
    %21 = vector.broadcast %20 : vector<1x256xf32> to vector<8x256xf32>
    %22 = arith.mulf %19, %21 : vector<8x256xf32>
    %c24 = arith.constant 24 : index
    %c0_20 = arith.constant 0 : index
    %23 = vector.load %arg9[%c24, %c0_20] : memref<72x256xf32, #tpu.memory_space<vmem>>, vector<8x256xf32>
    tpu.vector_store %arg9[%c24, %c0_20], %22 {strides = array<i32>} : memref<72x256xf32, #tpu.memory_space<vmem>>, vector<8x256xf32>,
    %c0_21 = arith.constant 0 : index
    %c128_22 = arith.constant 128 : index
    %24 = vector.load %arg8[%c0_21, %c128_22] : memref<8x512xf32, #tpu.memory_space<vmem>>, vector<8x256xf32>
    %c32 = arith.constant 32 : index
    %c0_23 = arith.constant 0 : index
    %25 = vector.load %arg9[%c32, %c0_23] : memref<72x256xf32, #tpu.memory_space<vmem>>, vector<8x256xf32>
    tpu.vector_store %arg9[%c32, %c0_23], %24 {strides = array<i32>} : memref<72x256xf32, #tpu.memory_space<vmem>>, vector<8x256xf32>,
    %c0_24 = arith.constant 0 : index
    %c129 = arith.constant 129 : index
    %26 = vector.load %arg8[%c0_24, %c129] : memref<8x512xf32, #tpu.memory_space<vmem>>, vector<8x256xf32>
    %c1_25 = arith.constant 1 : index
    %c0_26 = arith.constant 0 : index
    %27 = vector.load %arg2[%c1_25, %c0_26] : memref<2x256xf32, #tpu.memory_space<vmem>>, vector<1x256xf32>
    %28 = vector.broadcast %27 : vector<1x256xf32> to vector<8x256xf32>
    %29 = arith.mulf %26, %28 : vector<8x256xf32>
    %c40 = arith.constant 40 : index
    %c0_27 = arith.constant 0 : index
    %30 = vector.load %arg9[%c40, %c0_27] : memref<72x256xf32, #tpu.memory_space<vmem>>, vector<8x256xf32>
    tpu.vector_store %arg9[%c40, %c0_27], %29 {strides = array<i32>} : memref<72x256xf32, #tpu.memory_space<vmem>>, vector<8x256xf32>,
    %c0_28 = arith.constant 0 : index
    %c143 = arith.constant 143 : index
    %31 = vector.load %arg8[%c0_28, %c143] : memref<8x512xf32, #tpu.memory_space<vmem>>, vector<8x256xf32>
    %c0_29 = arith.constant 0 : index
    %c0_30 = arith.constant 0 : index
    %32 = vector.load %arg2[%c0_29, %c0_30] : memref<2x256xf32, #tpu.memory_space<vmem>>, vector<1x256xf32>
    %33 = vector.broadcast %32 : vector<1x256xf32> to vector<8x256xf32>
    %34 = arith.mulf %31, %33 : vector<8x256xf32>
    %c48 = arith.constant 48 : index
    %c0_31 = arith.constant 0 : index
    %35 = vector.load %arg9[%c48, %c0_31] : memref<72x256xf32, #tpu.memory_space<vmem>>, vector<8x256xf32>
    tpu.vector_store %arg9[%c48, %c0_31], %34 {strides = array<i32>} : memref<72x256xf32, #tpu.memory_space<vmem>>, vector<8x256xf32>,
    %c0_32 = arith.constant 0 : index
    %c144 = arith.constant 144 : index
    %36 = vector.load %arg8[%c0_32, %c144] : memref<8x512xf32, #tpu.memory_space<vmem>>, vector<8x256xf32>
    %c56 = arith.constant 56 : index
    %c0_33 = arith.constant 0 : index
    %37 = vector.load %arg9[%c56, %c0_33] : memref<72x256xf32, #tpu.memory_space<vmem>>, vector<8x256xf32>
    tpu.vector_store %arg9[%c56, %c0_33], %36 {strides = array<i32>} : memref<72x256xf32, #tpu.memory_space<vmem>>, vector<8x256xf32>,
    %c0_34 = arith.constant 0 : index
    %c145 = arith.constant 145 : index
    %38 = vector.load %arg8[%c0_34, %c145] : memref<8x512xf32, #tpu.memory_space<vmem>>, vector<8x256xf32>
    %c1_35 = arith.constant 1 : index
    %c0_36 = arith.constant 0 : index
    %39 = vector.load %arg2[%c1_35, %c0_36] : memref<2x256xf32, #tpu.memory_space<vmem>>, vector<1x256xf32>
    %40 = vector.broadcast %39 : vector<1x256xf32> to vector<8x256xf32>
    %41 = arith.mulf %38, %40 : vector<8x256xf32>
    %c64 = arith.constant 64 : index
    %c0_37 = arith.constant 0 : index
    %42 = vector.load %arg9[%c64, %c0_37] : memref<72x256xf32, #tpu.memory_space<vmem>>, vector<8x256xf32>
    tpu.vector_store %arg9[%c64, %c0_37], %41 {strides = array<i32>} : memref<72x256xf32, #tpu.memory_space<vmem>>, vector<8x256xf32>,
    %c0_38 = arith.constant 0 : index
    %c0_39 = arith.constant 0 : index
    %43 = vector.load %arg3[%c0_38, %c0_39] : memref<4x72xf32, #tpu.memory_space<vmem>>, vector<4x72xf32>
    %c0_40 = arith.constant 0 : index
    %c0_41 = arith.constant 0 : index
    %44 = vector.load %arg9[%c0_40, %c0_41] : memref<72x256xf32, #tpu.memory_space<vmem>>, vector<72x256xf32>
    %cst_42 = arith.constant dense<0.000000e+00> : vector<4x256xf32>
    %45 = tpu.matmul %43, %44, %cst_42 {dimension_numbers = #tpu.dot_dimension_numbers<[1], [0], [0], [1], [0, 0, 1, 1], [], []>} : vector<4x72xf32>, vector<72x256xf32>, vector<4x256xf32> -> vector<4x256xf32>
    %c0_43 = arith.constant 0 : index
    %c0_44 = arith.constant 0 : index
    %46 = vector.load %arg4[%c0_43, %c0_44] : memref<4x1xf32, #tpu.memory_space<vmem>>, vector<4x1xf32>
    %47 = vector.broadcast %46 : vector<4x1xf32> to vector<4x256xf32>
    %48 = arith.addf %45, %47 : vector<4x256xf32>
    %49 = arith.negf %48 : vector<4x256xf32>
    %50 = math.exp %49 : vector<4x256xf32>
    %cst_45 = arith.constant 1.000000e+00 : f32
    %51 = vector.broadcast %cst_45 : f32 to vector<4x256xf32>
    %52 = arith.addf %51, %50 : vector<4x256xf32>
    %53 = arith.divf %51, %52 : vector<4x256xf32>
    %54 = arith.mulf %48, %53 : vector<4x256xf32>
    %cst_46 = arith.constant 0.000000e+00 : f32
    %55 = vector.broadcast %cst_46 : f32 to vector<4x128xf32>
    %c0_47 = arith.constant 0 : index
    %c0_48 = arith.constant 0 : index
    %56 = vector.load %arg10[%c0_47, %c0_48] : memref<4x512xf32, #tpu.memory_space<vmem>>, vector<4x128xf32>
    tpu.vector_store %arg10[%c0_47, %c0_48], %55 {strides = array<i32>} : memref<4x512xf32, #tpu.memory_space<vmem>>, vector<4x128xf32>,
    %cst_49 = arith.constant 0.000000e+00 : f32
    %57 = vector.broadcast %cst_49 : f32 to vector<4x128xf32>
    %c0_50 = arith.constant 0 : index
    %c384_51 = arith.constant 384 : index
    %58 = vector.load %arg10[%c0_50, %c384_51] : memref<4x512xf32, #tpu.memory_space<vmem>>, vector<4x128xf32>
    tpu.vector_store %arg10[%c0_50, %c384_51], %57 {strides = array<i32>} : memref<4x512xf32, #tpu.memory_space<vmem>>, vector<4x128xf32>,
    %c0_52 = arith.constant 0 : index
    %c128_53 = arith.constant 128 : index
    %59 = vector.load %arg10[%c0_52, %c128_53] : memref<4x512xf32, #tpu.memory_space<vmem>>, vector<4x256xf32>
    tpu.vector_store %arg10[%c0_52, %c128_53], %54 {strides = array<i32>} : memref<4x512xf32, #tpu.memory_space<vmem>>, vector<4x256xf32>,
    %cst_54 = arith.constant 0.000000e+00 : f32
    %60 = vector.broadcast %cst_54 : f32 to vector<72x256xf32>
    %c0_55 = arith.constant 0 : index
    %c0_56 = arith.constant 0 : index
    %61 = vector.load %arg11[%c0_55, %c0_56] : memref<72x256xf32, #tpu.memory_space<vmem>>, vector<72x256xf32>
    tpu.vector_store %arg11[%c0_55, %c0_56], %60 {strides = array<i32>} : memref<72x256xf32, #tpu.memory_space<vmem>>, vector<72x256xf32>,
    %c0_57 = arith.constant 0 : index
    %c111_58 = arith.constant 111 : index
    %62 = vector.load %arg10[%c0_57, %c111_58] : memref<4x512xf32, #tpu.memory_space<vmem>>, vector<4x256xf32>
    %c0_59 = arith.constant 0 : index
    %c0_60 = arith.constant 0 : index
    %63 = vector.load %arg2[%c0_59, %c0_60] : memref<2x256xf32, #tpu.memory_space<vmem>>, vector<1x256xf32>
    %64 = vector.broadcast %63 : vector<1x256xf32> to vector<4x256xf32>
    %65 = arith.mulf %62, %64 : vector<4x256xf32>
    %c0_61 = arith.constant 0 : index
    %c0_62 = arith.constant 0 : index
    %66 = vector.load %arg11[%c0_61, %c0_62] : memref<72x256xf32, #tpu.memory_space<vmem>>, vector<4x256xf32>
    tpu.vector_store %arg11[%c0_61, %c0_62], %65 {strides = array<i32>} : memref<72x256xf32, #tpu.memory_space<vmem>>, vector<4x256xf32>,
    %c0_63 = arith.constant 0 : index
    %c112_64 = arith.constant 112 : index
    %67 = vector.load %arg10[%c0_63, %c112_64] : memref<4x512xf32, #tpu.memory_space<vmem>>, vector<4x256xf32>
    %c8_65 = arith.constant 8 : index
    %c0_66 = arith.constant 0 : index
    %68 = vector.load %arg11[%c8_65, %c0_66] : memref<72x256xf32, #tpu.memory_space<vmem>>, vector<4x256xf32>
    tpu.vector_store %arg11[%c8_65, %c0_66], %67 {strides = array<i32>} : memref<72x256xf32, #tpu.memory_space<vmem>>, vector<4x256xf32>,
    %c0_67 = arith.constant 0 : index
    %c113_68 = arith.constant 113 : index
    %69 = vector.load %arg10[%c0_67, %c113_68] : memref<4x512xf32, #tpu.memory_space<vmem>>, vector<4x256xf32>
    %c1_69 = arith.constant 1 : index
    %c0_70 = arith.constant 0 : index
    %70 = vector.load %arg2[%c1_69, %c0_70] : memref<2x256xf32, #tpu.memory_space<vmem>>, vector<1x256xf32>
    %71 = vector.broadcast %70 : vector<1x256xf32> to vector<4x256xf32>
    %72 = arith.mulf %69, %71 : vector<4x256xf32>
    %c16_71 = arith.constant 16 : index
    %c0_72 = arith.constant 0 : index
    %73 = vector.load %arg11[%c16_71, %c0_72] : memref<72x256xf32, #tpu.memory_space<vmem>>, vector<4x256xf32>
    tpu.vector_store %arg11[%c16_71, %c0_72], %72 {strides = array<i32>} : memref<72x256xf32, #tpu.memory_space<vmem>>, vector<4x256xf32>,
    %c0_73 = arith.constant 0 : index
    %c127_74 = arith.constant 127 : index
    %74 = vector.load %arg10[%c0_73, %c127_74] : memref<4x512xf32, #tpu.memory_space<vmem>>, vector<4x256xf32>
    %c0_75 = arith.constant 0 : index
    %c0_76 = arith.constant 0 : index
    %75 = vector.load %arg2[%c0_75, %c0_76] : memref<2x256xf32, #tpu.memory_space<vmem>>, vector<1x256xf32>
    %76 = vector.broadcast %75 : vector<1x256xf32> to vector<4x256xf32>
    %77 = arith.mulf %74, %76 : vector<4x256xf32>
    %c24_77 = arith.constant 24 : index
    %c0_78 = arith.constant 0 : index
    %78 = vector.load %arg11[%c24_77, %c0_78] : memref<72x256xf32, #tpu.memory_space<vmem>>, vector<4x256xf32>
    tpu.vector_store %arg11[%c24_77, %c0_78], %77 {strides = array<i32>} : memref<72x256xf32, #tpu.memory_space<vmem>>, vector<4x256xf32>,
    %c0_79 = arith.constant 0 : index
    %c128_80 = arith.constant 128 : index
    %79 = vector.load %arg10[%c0_79, %c128_80] : memref<4x512xf32, #tpu.memory_space<vmem>>, vector<4x256xf32>
    %c32_81 = arith.constant 32 : index
    %c0_82 = arith.constant 0 : index
    %80 = vector.load %arg11[%c32_81, %c0_82] : memref<72x256xf32, #tpu.memory_space<vmem>>, vector<4x256xf32>
    tpu.vector_store %arg11[%c32_81, %c0_82], %79 {strides = array<i32>} : memref<72x256xf32, #tpu.memory_space<vmem>>, vector<4x256xf32>,
    %c0_83 = arith.constant 0 : index
    %c129_84 = arith.constant 129 : index
    %81 = vector.load %arg10[%c0_83, %c129_84] : memref<4x512xf32, #tpu.memory_space<vmem>>, vector<4x256xf32>
    %c1_85 = arith.constant 1 : index
    %c0_86 = arith.constant 0 : index
    %82 = vector.load %arg2[%c1_85, %c0_86] : memref<2x256xf32, #tpu.memory_space<vmem>>, vector<1x256xf32>
    %83 = vector.broadcast %82 : vector<1x256xf32> to vector<4x256xf32>
    %84 = arith.mulf %81, %83 : vector<4x256xf32>
    %c40_87 = arith.constant 40 : index
    %c0_88 = arith.constant 0 : index
    %85 = vector.load %arg11[%c40_87, %c0_88] : memref<72x256xf32, #tpu.memory_space<vmem>>, vector<4x256xf32>
    tpu.vector_store %arg11[%c40_87, %c0_88], %84 {strides = array<i32>} : memref<72x256xf32, #tpu.memory_space<vmem>>, vector<4x256xf32>,
    %c0_89 = arith.constant 0 : index
    %c143_90 = arith.constant 143 : index
    %86 = vector.load %arg10[%c0_89, %c143_90] : memref<4x512xf32, #tpu.memory_space<vmem>>, vector<4x256xf32>
    %c0_91 = arith.constant 0 : index
    %c0_92 = arith.constant 0 : index
    %87 = vector.load %arg2[%c0_91, %c0_92] : memref<2x256xf32, #tpu.memory_space<vmem>>, vector<1x256xf32>
    %88 = vector.broadcast %87 : vector<1x256xf32> to vector<4x256xf32>
    %89 = arith.mulf %86, %88 : vector<4x256xf32>
    %c48_93 = arith.constant 48 : index
    %c0_94 = arith.constant 0 : index
    %90 = vector.load %arg11[%c48_93, %c0_94] : memref<72x256xf32, #tpu.memory_space<vmem>>, vector<4x256xf32>
    tpu.vector_store %arg11[%c48_93, %c0_94], %89 {strides = array<i32>} : memref<72x256xf32, #tpu.memory_space<vmem>>, vector<4x256xf32>,
    %c0_95 = arith.constant 0 : index
    %c144_96 = arith.constant 144 : index
    %91 = vector.load %arg10[%c0_95, %c144_96] : memref<4x512xf32, #tpu.memory_space<vmem>>, vector<4x256xf32>
    %c56_97 = arith.constant 56 : index
    %c0_98 = arith.constant 0 : index
    %92 = vector.load %arg11[%c56_97, %c0_98] : memref<72x256xf32, #tpu.memory_space<vmem>>, vector<4x256xf32>
    tpu.vector_store %arg11[%c56_97, %c0_98], %91 {strides = array<i32>} : memref<72x256xf32, #tpu.memory_space<vmem>>, vector<4x256xf32>,
    %c0_99 = arith.constant 0 : index
    %c145_100 = arith.constant 145 : index
    %93 = vector.load %arg10[%c0_99, %c145_100] : memref<4x512xf32, #tpu.memory_space<vmem>>, vector<4x256xf32>
    %c1_101 = arith.constant 1 : index
    %c0_102 = arith.constant 0 : index
    %94 = vector.load %arg2[%c1_101, %c0_102] : memref<2x256xf32, #tpu.memory_space<vmem>>, vector<1x256xf32>
    %95 = vector.broadcast %94 : vector<1x256xf32> to vector<4x256xf32>
    %96 = arith.mulf %93, %95 : vector<4x256xf32>
    %c64_103 = arith.constant 64 : index
    %c0_104 = arith.constant 0 : index
    %97 = vector.load %arg11[%c64_103, %c0_104] : memref<72x256xf32, #tpu.memory_space<vmem>>, vector<4x256xf32>
    tpu.vector_store %arg11[%c64_103, %c0_104], %96 {strides = array<i32>} : memref<72x256xf32, #tpu.memory_space<vmem>>, vector<4x256xf32>,
    %c0_105 = arith.constant 0 : index
    %c0_106 = arith.constant 0 : index
    %98 = vector.load %arg5[%c0_105, %c0_106] : memref<8x72xf32, #tpu.memory_space<vmem>>, vector<8x72xf32>
    %c0_107 = arith.constant 0 : index
    %c0_108 = arith.constant 0 : index
    %99 = vector.load %arg11[%c0_107, %c0_108] : memref<72x256xf32, #tpu.memory_space<vmem>>, vector<72x256xf32>
    %cst_109 = arith.constant dense<0.000000e+00> : vector<8x256xf32>
    %100 = tpu.matmul %98, %99, %cst_109 {dimension_numbers = #tpu.dot_dimension_numbers<[1], [0], [0], [1], [0, 0, 1, 1], [], []>} : vector<8x72xf32>, vector<72x256xf32>, vector<8x256xf32> -> vector<8x256xf32>
    %c0_110 = arith.constant 0 : index
    %c0_111 = arith.constant 0 : index
    %101 = vector.load %arg6[%c0_110, %c0_111] : memref<8x1xf32, #tpu.memory_space<vmem>>, vector<8x1xf32>
    %102 = vector.broadcast %101 : vector<8x1xf32> to vector<8x256xf32>
    %103 = arith.addf %100, %102 : vector<8x256xf32>
    %104 = arith.negf %103 : vector<8x256xf32>
    %105 = math.exp %104 : vector<8x256xf32>
    %cst_112 = arith.constant 1.000000e+00 : f32
    %106 = vector.broadcast %cst_112 : f32 to vector<8x256xf32>
    %107 = arith.addf %106, %105 : vector<8x256xf32>
    %108 = arith.divf %106, %107 : vector<8x256xf32>
    %109 = arith.mulf %103, %108 : vector<8x256xf32>
    %c0_113 = arith.constant 0 : index
    %c0_114 = arith.constant 0 : index
    %c0_115 = arith.constant 0 : index
    %110 = vector.load %arg1[%c0_113, %c0_114, %c0_115] : memref<1x8x256xf32, #tpu.memory_space<vmem>>, vector<1x8x256xf32>
    %111 = vector.shape_cast %110 : vector<1x8x256xf32> to vector<8x256xf32>
    %112 = arith.addf %109, %111 : vector<8x256xf32>
    %c0_116 = arith.constant 0 : index
    %c0_117 = arith.constant 0 : index
    %c0_118 = arith.constant 0 : index
    %113 = vector.load %arg7[%c0_116, %c0_117, %c0_118] : memref<1x8x256xf32, #tpu.memory_space<vmem>>, vector<1x8x256xf32>
    %114 = vector.shape_cast %113 : vector<1x8x256xf32> to vector<8x256xf32>
    %115 = vector.shape_cast %112 : vector<8x256xf32> to vector<1x8x256xf32>
    tpu.vector_store %arg7[%c0_116, %c0_117, %c0_118], %115 {strides = array<i32>} : memref<1x8x256xf32, #tpu.memory_space<vmem>>, vector<1x8x256xf32>,
    return
  }
  func.func @transform_0(%arg0: i32) -> (i32, i32, i32) {
    %c0_i32 = arith.constant 0 : i32
    %c0_i32_0 = arith.constant 0 : i32
    %c0_i32_1 = arith.constant 0 : i32
    return %arg0, %c0_i32, %c0_i32_0 : i32, i32, i32
  }
  func.func @transform_1(%arg0: i32) -> (i32, i32) {
    %c0_i32 = arith.constant 0 : i32
    %c0_i32_0 = arith.constant 0 : i32
    %c0_i32_1 = arith.constant 0 : i32
    return %c0_i32, %c0_i32_0 : i32, i32
  }
  func.func @transform_2(%arg0: i32) -> (i32, i32) {
    %c0_i32 = arith.constant 0 : i32
    %c0_i32_0 = arith.constant 0 : i32
    %c0_i32_1 = arith.constant 0 : i32
    return %c0_i32, %c0_i32_0 : i32, i32
  }
  func.func @transform_3(%arg0: i32) -> (i32, i32) {
    %c0_i32 = arith.constant 0 : i32
    %c0_i32_0 = arith.constant 0 : i32
    %c0_i32_1 = arith.constant 0 : i32
    return %c0_i32, %c0_i32_0 : i32, i32
  }
  func.func @transform_4(%arg0: i32) -> (i32, i32) {
    %c0_i32 = arith.constant 0 : i32
    %c0_i32_0 = arith.constant 0 : i32
    %c0_i32_1 = arith.constant 0 : i32
    return %c0_i32, %c0_i32_0 : i32, i32
  }
  func.func @transform_5(%arg0: i32) -> (i32, i32) {
    %c0_i32 = arith.constant 0 : i32
    %c0_i32_0 = arith.constant 0 : i32
    %c0_i32_1 = arith.constant 0 : i32
    return %c0_i32, %c0_i32_0 : i32, i32
  }
  func.func @transform_6(%arg0: i32) -> (i32, i32, i32) {
    %c0_i32 = arith.constant 0 : i32
    %c0_i32_0 = arith.constant 0 : i32
    %c0_i32_1 = arith.constant 0 : i32
    return %arg0, %c0_i32, %c0_i32_0 : i32, i32, i32
  }
}

</mosaic_0001>

<bundles_post_ra>
// kernel: bottleneck_condconv.1
= control target key start
LH: loop header
LB: loop body
LE: loop exit
PB: predicated region body
PF: predicated region fallthrough
CT: control target
= control target key end

     0   :  { %s1225_s21 = smov 0   ;;  %s1489_s0 = inlined_call_operand.vmem [shape: f32[2,8,256], index: 0, kind: input, shape index: {}]   ;;  %s1490_s1 = inlined_call_operand.vmem [shape: f32[2,256], index: 1, kind: input, shape index: {}]   ;;  %s1491_s2 = inlined_call_operand.vmem [shape: f32[4,72], index: 2, kind: input, shape index: {}]   ;;  %s1492_s3 = inlined_call_operand.vmem [shape: f32[4,1], index: 3, kind: input, shape index: {}]   ;;  %s1493_s4 = inlined_call_operand.vmem [shape: f32[8,72], index: 4, kind: input, shape index: {}]   ;;  %s1494_s5 = inlined_call_operand.vmem [shape: f32[8,1], index: 5, kind: input, shape index: {}]   ;;  %s1495_s6 = inlined_call_operand.vmem [shape: f32[2,8,256], index: 6, kind: output, shape index: {}]  }
   0x1 LB: > { %s1110_s22 = sadd.s32 4294967295, %s1178_s21   ;;  %p1114_p0 = scmp.ge.s32.totalorder %s1178_s21, 1  ;;  %s1178_s21 = sphi %s1225_s21, %s16_s21  }
   0x2   : > { %p212_p1 = scmp.lt.s32.totalorder %s1178_s21, 3 }
   0x4   : > { %p213_p2 = pnand %p1114_p0, %p212_p1 }
   0x5   : > { %s1181_s27 = smov (!%p213_p2), 17   ;;  %s1182_s28 = smov (!%p213_p2), 15  }
   0x6   : > { %216 = sbr.rel (%p213_p2) target bundleno = 922 (0x39a), region = 44  ;;  %p242_p3 = scmp.lt.s32.totalorder (!%p213_p2), %s1110_s22, 1 }
   0x7   : > { %s1183_s9 = smov (!%p213_p2), 1   ;;  %s1184_s12 = smov (!%p213_p2), 127  }
   0x8   : > { %s1185_s16 = smov (!%p213_p2), 113   ;;  %s1186_s20 = smov (!%p213_p2), 111  }
   0x9   : > { %s1187_s23 = smov (!%p213_p2), 112   ;;  %s1188_s24 = smov (!%p213_p2), 16  }
   0xb   : > { %v263_v0 = vlaneseq  ;;  %v1180_v1 = vmov 0.0   ;;  %v1121_v3 = vld [vmem:[%s1490_s1 + $0x1] ss:$2 sm:$0x3]  ;;  %s1497_s22 = smov (!%p242_p3, %s1110_s22), 1  ;;  %vm292_vm0 = vcmask 138240  }
   0xc   : > { %655 = vst [vmem:[#allocation4] sm:$0xf] %v1180_v1  ;;  %656 = vst [vmem:[#allocation4 + $0xc] sm:$0xf] %v1180_v1  ;;  %634 = vmatprep.mubr.f32.mxu0 %v1180_v1  ;;  %1028 = vmatprep.mubr.f32.mxu1 %v1180_v1  ;;  %s1133_s15 = sshll.u32 %s1497_s22, 4  ;;  %vm353_vm1 = vcmask 121856  }
   0xd   : > { %662 = vst [vmem:[#allocation5] sm:$0xff] %v1180_v1  ;;  %663 = vst [vmem:[#allocation5 + $0x38] sm:$0xff] %v1180_v1  ;;  %v264_v2 = vshrl.u32 %v263_v0, 7  ;;  %v447_v4 = vld [vmem:[%s1490_s1] ss:$2 sm:$0x3]  ;;  %s246_s19 = scalar_lea.vmem %s1489_s0, %s1133_s15 }
   0xe   : > { %664 = vst [vmem:[#allocation5 + $0x78] sm:$0xff] %v1180_v1  ;;  %665 = vst [vmem:[#allocation5 + $0x58] sm:$0xff] %v1180_v1  ;;  %v1120_v11 = vld [vmem:[%s1490_s1 + $0x1] ss:$2 sm:$0x3]  ;;  %v1313_v23 = vld [vmem:[%s246_s19 + $0x8] sm:$0xff] }
   0xf   : > { %666 = vst [vmem:[#allocation5 + $0x20] sm:$0xff] %v1180_v1  ;;  %667 = vst [vmem:[#allocation5 + $0x8] sm:$0xff] %v1180_v1  ;;  %v1261_v5 = vsub.s32 0, %v264_v2  ;;  %v1263_v6 = vsub.s32 1, %v264_v2  ;;  %v1319_v24 = vld [vmem:[%s246_s19] sm:$0xff]  ;;  %vm394_vm2 = vcmask 7168  }
  0x10   : > { %668 = vst [vmem:[#allocation5 + $0x70] sm:$0xff] %v1180_v1  ;;  %669 = vst [vmem:[#allocation5 + $0x80] sm:$0xff] %v1180_v1  ;;  %v363_v14 = vld [vmem:[%s1490_s1] ss:$2 sm:$0x3]  ;;  %vm377_vm3 = vcmask 1039360  }
  0x11   : > { %670 = vst [vmem:[#allocation5 + $0x88] sm:$0xff] %v1180_v1  ;;  %671 = vst [vmem:[#allocation5 + $0x40] sm:$0xff] %v1180_v1  ;;  %v510_v7 = vrot.slane %v1121_v3, %v1261_v5  ;;  %v452_v8 = vrot.slane %v447_v4, %v1261_v5  ;;  %v514_v9 = vrot.slane %v1121_v3, %v1263_v6  ;;  %v1119_v17 = vld [vmem:[%s1490_s1 + $0x1] ss:$2 sm:$0x3]  ;;  %vm336_vm4 = vcmask 924672  }
  0x12   : > { %672 = vst [vmem:[#allocation5 + $0x50] sm:$0xff] %v1180_v1  ;;  %673 = vst [vmem:[#allocation5 + $0x28] sm:$0xff] %v1180_v1  ;;  %v456_v10 = vrot.slane %v447_v4, %v1263_v6  ;;  %v417_v12 = vrot.slane %v1120_v11, %v1263_v6  ;;  %v413_v13 = vrot.slane %v1120_v11, %v1261_v5  ;;  %v261_v20 = vld [vmem:[%s1490_s1] ss:$2 sm:$0x3]  ;;  %vm275_vm5 = vcmask 908288  }
  0x13   : > { %674 = vst [vmem:[#allocation5 + $0x10] sm:$0xff] %v1180_v1  ;;  %675 = vst [vmem:[#allocation5 + $0x48] sm:$0xff] %v1180_v1  ;;  %515 = vrot.lane.b32.xlu0 %v510_v7, %s1181_s27  ;;  %457 = vrot.lane.b32.xlu1 %v452_v8, %s1182_s28  ;;  %v372_v15 = vrot.slane %v363_v14, %v1263_v6  ;;  %v368_v16 = vrot.slane %v363_v14, %v1261_v5  ;;  %v1189_v58 = vmov 0   ;;  %v1127_v60 = vld [vmem:[%s1490_s1 + $0x1] ss:$2 sm:$0x3] }
  0x14   : > { %676 = vst [vmem:[#allocation5 + $0x30] sm:$0xff] %v1180_v1  ;;  %677 = vst [vmem:[#allocation5 + $0x18] sm:$0xff] %v1180_v1  ;;  %v331_v18 = vrot.slane %v1119_v17, %v1263_v6  ;;  %v327_v19 = vrot.slane %v1119_v17, %v1261_v5  ;;  %v270_v21 = vrot.slane %v261_v20, %v1263_v6  ;;  %1153 = vset.pattern.permute.xlu0 %v1189_v58  ;;  %v849_v63 = vld [vmem:[%s1490_s1] ss:$2 sm:$0x3]  ;;  %vm495_vm6 = vcmask 916480  }
  0x15   : > { %678 = vst [vmem:[#allocation5 + $0x68] sm:$0xff] %v1180_v1  ;;  %679 = vst [vmem:[#allocation5 + $0x60] sm:$0xff] %v1180_v1  ;;  %v266_v22 = vrot.slane %v261_v20, %v1261_v5  ;;  %v907_v61 = vrot.slane %v1127_v60, %v1261_v5  ;;  %v911_v62 = vrot.slane %v1127_v60, %v1263_v6  ;;  %v1126_v0 = vld [vmem:[%s1490_s1 + $0x1] ss:$2 sm:$0x3]  ;;  %vm311_vm7 = vcmask 130048  }
  0x16   : > { %v854_v4 = vrot.slane %v849_v63, %v1261_v5  ;;  %v818_v8 = vrot.slane %v1126_v0, %v1261_v5  ;;  %v560_v11 = vld [vmem:[%s1492_s3] sm:$0xf]  ;;  %vm566_vm8 = vcmask 588800  }
  0x17   : > { %517 = vrot.lane.b32.xlu0 %v514_v9, %s1181_s27  ;;  %459 = vrot.lane.b32.xlu1 %v456_v10, %s1182_s28  ;;  %v912_v7 = vcombine.low %v907_v61, %v911_v62  ;;  %v822_v9 = vrot.slane %v1126_v0, %v1263_v6  ;;  %v771_v10 = vld [vmem:[%s1490_s1] ss:$2 sm:$0x3] }
  0x18   : > { %v776_v14 = vrot.slane %v771_v10, %v1261_v5 }
  0x1b   : > { %420 = vrot.lane.b32.xlu1 %v417_v12, %s1183_s9  ;;  %418 = vrot.lane.b32.xlu0 %v413_v13, %s1183_s9  ;;  %v1125_v12 = vld [vmem:[%s1490_s1 + $0x1] ss:$2 sm:$0x3] }
  0x1c   : > { %v740_v17 = vrot.slane %v1125_v12, %v1261_v5 }
  0x1f   : > { %375 = vrot.lane.b32.xlu1 %v372_v15, %s1184_s12  ;;  %373 = vrot.lane.b32.xlu0 %v368_v16, %s1184_s12  ;;  %v780_v15 = vrot.slane %v771_v10, %v1263_v6  ;;  %v823_v16 = vcombine.low %v818_v8, %v822_v9 }
  0x21   : > { %v781_v20 = vcombine.low %v776_v14, %v780_v15  ;;  %v884_v15 = vld [vmem:[#allocation4 + $0xc] sm:$0xf] }
  0x23   : > { %334 = vrot.lane.b32.xlu1 %v331_v18, %s1185_s16  ;;  %332 = vrot.lane.b32.xlu0 %v327_v19, %s1185_s16  ;;  %v744_v18 = vrot.slane %v1125_v12, %v1263_v6  ;;  %v682_v19 = vld [vmem:[%s1490_s1] ss:$2 sm:$0x3] }
  0x27   : > { %273 = vrot.lane.b32.xlu1 %v270_v21, %s1186_s20  ;;  %271 = vrot.lane.b32.xlu0 %v266_v22, %s1186_s20  ;;  %v745_v21 = vcombine.low %v740_v17, %v744_v18  ;;  %v687_v22 = vrot.slane %v682_v19, %v1261_v5  ;;  %v812_v17 = vld [vmem:[#allocation4 + $0xc] sm:$0xf] }
  0x2b   : > { %491 = vrot.lane.b32.xlu1 %v1313_v23, %s1187_s23  ;;  %493 = vrot.lane.b32.xlu0 %v1180_v1, %s1187_s23 }
  0x2f   : > { %489 = vrot.lane.b32.xlu1 %v1319_v24, %s1187_s23  ;;  %307 = vrot.lane.b32.xlu0 %v1319_v24, %s1188_s24 }
  0x33   : > { %309 = vrot.lane.b32.xlu1 %v1313_v23, %s1188_s24 }
  0x85   : > { %v516_v25 = vpop.permute.xlu0 %515  ;;  %v458_v26 = vpop.permute.xlu1 %457 }
  0x86   : > { %v523_v27 = vmul.f32 %v516_v25, %v1319_v24  ;;  %v465_v30 = vmul.f32 %v458_v26, %v1319_v24 }
  0x88   : > { %529 = vrot.lane.b32.xlu0 %v523_v27, %s1186_s20 }
  0x89   : > { %v518_v28 = vpop.permute.xlu0 %517  ;;  %v460_v29 = vpop.permute.xlu1 %459 }
  0x8a   : > { %v525_v31 = vmul.f32 0.0, %v518_v28  ;;  %v467_v34 = vmul.f32 0.0, %v460_v29  ;;  %v519_v43 = vsel %vm292_vm0, %v516_v25, %v518_v28  ;;  %v461_v47 = vsel %vm353_vm1, %v458_v26, %v460_v29 }
  0x8b   : > { %v524_v46 = vmul.f32 %v519_v43, %v1313_v23  ;;  %v466_v49 = vmul.f32 %v461_v47, %v1313_v23  ;;  %v691_v25 = vrot.slane %v682_v19, %v1263_v6 }
  0x8c   : > { %533 = vrot.lane.b32.xlu1 %v525_v31, %s1186_s20  ;;  %471 = vrot.lane.b32.xlu0 %v465_v30, %s1185_s16 }
  0x8d   : > { %v421_v32 = vpop.permute.xlu1 %420  ;;  %v419_v33 = vpop.permute.xlu0 %418  ;;  %v692_v26 = vcombine.low %v687_v22, %v691_v25 }
  0x8e   : > { %v428_v35 = vmul.f32 0.0, %v421_v32  ;;  %v426_v38 = vmul.f32 %v419_v33, %v1319_v24  ;;  %v422_v48 = vsel %vm394_vm2, %v419_v33, %v421_v32 }
  0x8f   : > { %v427_v50 = vmul.f32 %v422_v48, %v1313_v23 }
  0x90   : > { %475 = vrot.lane.b32.xlu1 %v467_v34, %s1185_s16  ;;  %436 = vrot.lane.b32.xlu0 %v428_v35, %s1184_s12 }
  0x91   : > { %v376_v36 = vpop.permute.xlu1 %375  ;;  %v374_v37 = vpop.permute.xlu0 %373 }
  0x92   : > { %v382_v39 = vmul.f32 0.0, %v374_v37  ;;  %v384_v41 = vmul.f32 %v376_v36, %v1313_v23  ;;  %v378_v53 = vsel %vm377_vm3, %v374_v37, %v376_v36 }
  0x93   : > { %v383_v56 = vmul.f32 %v378_v53, %v1319_v24 }
  0x94   : > { %388 = vrot.lane.b32.xlu0 %v382_v39, %s1183_s9  ;;  %432 = vrot.lane.b32.xlu1 %v426_v38, %s1184_s12 }
  0x95   : > { %v335_v40 = vpop.permute.xlu1 %334  ;;  %v333_v44 = vpop.permute.xlu0 %332 }
  0x96   : > { %v343_v42 = vmul.f32 %v335_v40, %v1313_v23  ;;  %v341_v45 = vmul.f32 0.0, %v333_v44  ;;  %v337_v54 = vsel %vm336_vm4, %v333_v44, %v335_v40 }
  0x97   : > { %v342_v57 = vmul.f32 %v337_v54, %v1319_v24 }
  0x98   : > { %351 = vrot.lane.b32.xlu0 %v343_v42, %s1182_s28  ;;  %392 = vrot.lane.b32.xlu1 %v384_v41, %s1183_s9 }
  0x99   : > { %v274_v51 = vpop.permute.xlu1 %273  ;;  %v272_v52 = vpop.permute.xlu0 %271 }
  0x9a   : > { %v276_v55 = vsel %vm275_vm5, %v272_v52, %v274_v51  ;;  %v282_v2 = vmul.f32 %v274_v51, %v1313_v23  ;;  %v280_v3 = vmul.f32 0.0, %v272_v52 }
  0x9b   : > { %v281_v59 = vmul.f32 %v276_v55, %v1319_v24 }
  0x9c   : > { %531 = vrot.lane.b32.xlu0 %v524_v46, %s1186_s20  ;;  %347 = vrot.lane.b32.xlu1 %v341_v45, %s1182_s28 }
  0x9d   : > { %v492_v27 = vpop.permute.xlu1 %491  ;;  %v494_v28 = vpop.permute.xlu0 %493 }
  0x9e   : > { %v497_v43 = vsel %vm495_vm6, %v492_v27, %v494_v28 }
  0xa0   : > { %473 = vrot.lane.b32.xlu0 %v466_v49, %s1185_s16  ;;  %434 = vrot.lane.b32.xlu1 %v427_v50, %s1184_s12 }
  0xa1   : > { %v490_v29 = vpop.permute.xlu1 %489  ;;  %v308_v30 = vpop.permute.xlu0 %307 }
  0xa2   : > { %v496_v46 = vsel %vm495_vm6, %v490_v29, %v492_v27 }
  0xa4   : > { %390 = vrot.lane.b32.xlu0 %v383_v56, %s1183_s9  ;;  %349 = vrot.lane.b32.xlu1 %v342_v57, %s1182_s28 }
  0xa5   : > { %v310_v31 = vpop.permute.xlu1 %309 }
  0xa8   : > { %305 = vrot.lane.b32.xlu0 %v1180_v1, %s1188_s24  ;;  %288 = vrot.lane.b32.xlu1 %v281_v59, %s1181_s27  ;;  %v858_v1 = vrot.slane %v849_v63, %v1263_v6  ;;  %v313_v59 = vsel %vm311_vm7, %v308_v30, %v310_v31 }
  0xaa   : > { %v859_v13 = vcombine.low %v854_v4, %v858_v1 }
  0xac   : > { %290 = vrot.lane.b32.xlu0 %v282_v2, %s1181_s27  ;;  %286 = vrot.lane.b32.xlu1 %v280_v3, %s1181_s27  ;;  %v541_v2 = vld [vmem:[%s1491_s2] sm:$0xf] }
  0xb0   : > { %563 = vperm.xlu0 %1153, %v560_v11   ;;  %913 = vrot.lane.b32.xlu1 %v912_v7, %s1181_s27  ;;  %v901_v7 = vld [vmem:[#allocation4 + $0xc] sm:$0xf] }
  0xb4   : > { %860 = vrot.lane.b32.xlu1 %v859_v13, %s1182_s28  ;;  %824 = vrot.lane.b32.xlu0 %v823_v16, %s1183_s9  ;;  %v848_v13 = vld [vmem:[#allocation4 + $0xc] sm:$0xf] }
  0xb8   : > { %782 = vrot.lane.b32.xlu1 %v781_v20, %s1184_s12  ;;  %746 = vrot.lane.b32.xlu0 %v745_v21, %s1185_s16 }
  0xbc   : > { %693 = vrot.lane.b32.xlu1 %v692_v26, %s1186_s20  ;;  %892 = vrot.lane.b32.xlu0 %v884_v15, %s1187_s23 }
  0xfa   : > { %v530_v32 = vpop.permute.xlu0 %529 }
  0xfe   : > { %v534_v33 = vpop.permute.xlu1 %533  ;;  %v472_v34 = vpop.permute.xlu0 %471 }
 0x102   : > { %v476_v35 = vpop.permute.xlu1 %475  ;;  %v437_v36 = vpop.permute.xlu0 %436 }
 0x106   : > { %v389_v5 = vpop.permute.xlu0 %388  ;;  %v433_v37 = vpop.permute.xlu1 %432 }
 0x10a   : > { %v352_v6 = vpop.permute.xlu0 %351  ;;  %v393_v38 = vpop.permute.xlu1 %392 }
 0x10e   : > { %v532_v39 = vpop.permute.xlu0 %531  ;;  %v348_v40 = vpop.permute.xlu1 %347 }
 0x10f   : > { %v536_v41 = vsel %vm275_vm5, %v532_v39, %v534_v33  ;;  %v535_v42 = vsel %vm275_vm5, %v530_v32, %v532_v39 }
 0x110   : > { %584 = vmatprep.subr.mxu0 %v536_v41 }
 0x111   : > { %585 = vmatpush1.msra.mxu0 %v535_v42 }
 0x112   : > { %586 = vmatprep.subr.mxu0 %v497_v43  ;;  %v474_v44 = vpop.permute.xlu0 %473  ;;  %v435_v45 = vpop.permute.xlu1 %434 }
 0x113   : > { %587 = vmatpush1.msra.mxu0 %v496_v46  ;;  %v478_v47 = vsel %vm336_vm4, %v474_v44, %v476_v35  ;;  %v477_v48 = vsel %vm336_vm4, %v472_v34, %v474_v44  ;;  %v439_v49 = vsel %vm377_vm3, %v435_v45, %v437_v36  ;;  %v438_v52 = vsel %vm377_vm3, %v433_v37, %v435_v45 }
 0x114   : > { %588 = vmatprep.subr.mxu0 %v478_v47 }
 0x115   : > { %589 = vmatpush1.msra.mxu0 %v477_v48 }
 0x116   : > { %590 = vmatprep.subr.mxu0 %v439_v49  ;;  %v391_v50 = vpop.permute.xlu0 %390  ;;  %v350_v51 = vpop.permute.xlu1 %349 }
 0x117   : > { %591 = vmatpush1.msra.mxu0 %v438_v52  ;;  %v396_v53 = vsel %vm394_vm2, %v391_v50, %v393_v38  ;;  %v395_v56 = vsel %vm394_vm2, %v389_v5, %v391_v50  ;;  %v355_v57 = vsel %vm353_vm1, %v350_v51, %v352_v6  ;;  %v354_v58 = vsel %vm353_vm1, %v348_v40, %v350_v51 }
 0x118   : > { %592 = vmatprep.subr.mxu0 %v1313_v23 }
 0x119   : > { %593 = vmatpush1.msra.mxu0 %v1319_v24 }
 0x11a   : > { %594 = vmatprep.subr.mxu0 %v396_v53  ;;  %v306_v54 = vpop.permute.xlu0 %305  ;;  %v289_v55 = vpop.permute.xlu1 %288 }
 0x11b   : > { %595 = vmatpush1.msra.mxu0 %v395_v56  ;;  %v312_v62 = vsel %vm311_vm7, %v306_v54, %v308_v30 }
 0x11c   : > { %596 = vmatprep.subr.mxu0 %v355_v57 }
 0x11d   : > { %597 = vmatpush1.msra.mxu0 %v354_v58 }
 0x11e   : > { %v291_v60 = vpop.permute.xlu0 %290  ;;  %598 = vmatprep.subr.mxu0 %v313_v59  ;;  %v287_v61 = vpop.permute.xlu1 %286 }
 0x11f   : > { %599 = vmatpush1.msra.mxu0 %v312_v62  ;;  %v294_v63 = vsel %vm292_vm0, %v289_v55, %v291_v60  ;;  %v293_v0 = vsel %vm292_vm0, %v287_v61, %v289_v55 }
 0x120   : > { %600 = vmatprep.subr.mxu0 %v294_v63 }
 0x121   : > { %601 = vmatpush1.msra.mxu0 %v293_v0 }
 0x122   : > { %1122 = vmatmul.mubr.msk.f32.vlgmr.msra.gmra.mxu0 %vm566_vm8, %v541_v2  ;;  %v914_v3 = vpop.permute.xlu1 %913 }
 0x123   : > { %v915_v1 = vrot.slane %v914_v3, 4 }
 0x125   : > { %v920_v8 = vmul.f32 %v915_v1, %v901_v7  ;;  %v916_v10 = vsel %vm292_vm0, %v915_v1, %v914_v3 }
 0x126   : > { %v861_v9 = vpop.permute.xlu1 %860 }
 0x127   : > { %v862_v11 = vrot.slane %v861_v9, 4  ;;  %928 = vrot.lane.b32.xlu1 %v920_v8, %s1186_s20 }
 0x129   : > { %v867_v16 = vmul.f32 %v862_v11, %v848_v13  ;;  %v863_v19 = vsel %vm353_vm1, %v862_v11, %v861_v9 }
 0x12a   : > { %v783_v6 = vpop.permute.xlu1 %782 }
 0x12b   : > { %v564_v4 = vpop.permute.xlu0 %563  ;;  %875 = vrot.lane.b32.xlu1 %v867_v16, %s1185_s16  ;;  %v784_v39 = vrot.slane %v783_v6, 4 }
 0x12d   : > { %v785_v41 = vsel %vm377_vm3, %v784_v39, %v783_v6 }
 0x12e   : > { %v694_v55 = vpop.permute.xlu1 %693 }
 0x12f   : > { %v825_v12 = vpop.permute.xlu0 %824  ;;  %v695_v57 = vrot.slane %v694_v55, 4 }
 0x130   : > { %v826_v14 = vrot.slane %v825_v12, 4 }
 0x131   : > { %v696_v60 = vsel %vm275_vm5, %v695_v57, %v694_v55 }
 0x132   : > { %v827_v18 = vsel %vm394_vm2, %v826_v14, %v825_v12  ;;  %v831_v20 = vmul.f32 %v826_v14, %v812_v17 }
 0x133   : > { %v747_v42 = vpop.permute.xlu0 %746 }
 0x134   : > { %839 = vrot.lane.b32.xlu0 %v831_v20, %s1184_s12  ;;  %v748_v45 = vrot.slane %v747_v42, 4 }
 0x136   : > { %v749_v53 = vsel %vm336_vm4, %v748_v45, %v747_v42 }
 0x137   : > { %v893_v1 = vpop.permute.xlu0 %892 }
 0x199   : > { %v929_v7 = vpop.permute.xlu1 %928 }
 0x19d   : > { %v876_v9 = vpop.permute.xlu1 %875 }
 0x1a6   : > { %v840_v8 = vpop.permute.xlu0 %839 }
 0x1e2   : > { %v636_v21 = vpop.f32.mrf.mxu0 }
 0x1e3   : > { %v637_v22 = vadd.f32 %v636_v21, %v564_v4 }
 0x1e4   : > { %v638_v25 = vpop.f32.mrf.mxu0 }
 0x1e5   : > { %v1123_v26 = vmul.f32 -1.442695, %v637_v22  ;;  %v639_v27 = vadd.f32 %v638_v25, %v564_v4  ;;  %v955_v4 = vld [vmem:[%s1494_s5] sm:$0xff] }
 0x1e7   : > { %1155 = vpow2.f32 %v1123_v26  ;;  %v1124_v28 = vmul.f32 -1.442695, %v639_v27 }
 0x1e9   : > { %1157 = vpow2.f32 %v1124_v28 }
 0x1f4   : > { %v1156_v29 = vpop.eup %1155 }
 0x1f5   : > { %v647_v30 = vadd.f32 1.0, %v1156_v29 }
 0x1f6   : > { %v1158_v31 = vpop.eup %1157 }
 0x1f7   : > { %1159 = vrcp.f32 %v647_v30  ;;  %v648_v32 = vadd.f32 1.0, %v1158_v31 }
 0x1f9   : > { %1161 = vrcp.f32 %v648_v32 }
 0x204   : > { %v1160_v33 = vpop.eup %1159 }
 0x205   : > { %v653_v35 = vmul.f32 %v1160_v33, %v637_v22 }
 0x206   : > { %v1162_v34 = vpop.eup %1161 }
 0x207   : > { %v654_v36 = vmul.f32 %v1162_v34, %v639_v27 }
 0x209   : > { %v659_v5 = vcombine.low %v653_v35, %v654_v36  ;;  %v1171_v38 = vcombine.low %v654_v36, %v654_v36 }
 0x20b   : > { %661 = vst [vmem:[#allocation4 + $0x4] sm:$0xff] %v659_v5  ;;  %v919_v37 = vmul.f32 %v916_v10, %v659_v5  ;;  %888 = vrot.lane.b32.xlu1 %v659_v5, %s1187_s23  ;;  %809 = vst [vmem:[#allocation5 + $0x88] sm:$0xf] %v659_v5  ;;  %v866_v40 = vmul.f32 %v863_v19, %v659_v5  ;;  %v830_v49 = vmul.f32 %v827_v18, %v659_v5 }
 0x20c   : > { %810 = vst [vmem:[#allocation5 + $0x40] sm:$0xf] %v1171_v38 }
 0x20d   : > { %924 = vrot.lane.b32.xlu0 %v919_v37, %s1186_s20  ;;  %v923_v54 = vcombine.high %v919_v37, %v919_v37  ;;  %v870_v58 = vcombine.high %v866_v40, %v866_v40  ;;  %v834_v59 = vcombine.high %v830_v49, %v830_v49 }
 0x211   : > { %871 = vrot.lane.b32.xlu0 %v866_v40, %s1185_s16 }
 0x212   : > { %v769_v43 = vld [vmem:[#allocation4] sm:$0xff]  ;;  %v717_v46 = vld [vmem:[#allocation4 + $0x8] sm:$0xf] }
 0x213   : > { %v788_v44 = vmul.f32 %v785_v41, %v769_v43  ;;  %v734_v47 = vld [vmem:[#allocation4 + $0x8] sm:$0xf]  ;;  %725 = vrot.lane.b32.xlu1 %v717_v46, %s1188_s24  ;;  %v720_v51 = vcombine.high %v769_v43, %v769_v43  ;;  %v752_v56 = vmul.f32 %v769_v43, %v749_v53  ;;  %v699_v62 = vmul.f32 %v769_v43, %v696_v60 }
 0x214   : > { %v753_v48 = vmul.f32 %v748_v45, %v734_v47  ;;  %v770_v50 = vld [vmem:[#allocation4 + $0x8] sm:$0xf] }
 0x215   : > { %793 = vrot.lane.b32.xlu0 %v788_v44, %s1183_s9  ;;  %v789_v52 = vmul.f32 %v784_v39, %v770_v50  ;;  %v792_v61 = vcombine.high %v788_v44, %v788_v44  ;;  %v756_v63 = vcombine.high %v752_v56, %v752_v56  ;;  %v681_v0 = vld [vmem:[#allocation4 + $0x8] sm:$0xf]  ;;  %v703_v2 = vcombine.high %v699_v62, %v699_v62 }
 0x216   : > { %v700_v3 = vmul.f32 %v695_v57, %v681_v0 }
 0x217   : > { %890 = vrot.lane.b32.xlu1 %v1171_v38, %s1187_s23  ;;  %s251_s23 = scalar_lea.vmem %s1495_s6, %s1133_s15 }
 0x219   : > { %761 = vrot.lane.b32.xlu0 %v753_v48, %s1182_s28 }
 0x21b   : > { %835 = vrot.lane.b32.xlu1 %v830_v49, %s1184_s12 }
 0x21d   : > { %723 = vrot.lane.b32.xlu0 %v720_v51, %s1188_s24 }
 0x21f   : > { %797 = vrot.lane.b32.xlu1 %v789_v52, %s1183_s9  ;;  %v946_v52 = vld [vmem:[#allocation5 + $0x40] sm:$0xff] }
 0x221   : > { %926 = vrot.lane.b32.xlu0 %v923_v54, %s1186_s20  ;;  %v945_v54 = vld [vmem:[#allocation5 + $0x88] sm:$0xff] }
 0x223   : > { %757 = vrot.lane.b32.xlu1 %v752_v56, %s1182_s28 }
 0x225   : > { %873 = vrot.lane.b32.xlu0 %v870_v58, %s1185_s16 }
 0x227   : > { %837 = vrot.lane.b32.xlu1 %v834_v59, %s1184_s12 }
 0x229   : > { %795 = vrot.lane.b32.xlu0 %v792_v61, %s1183_s9 }
 0x22b   : > { %759 = vrot.lane.b32.xlu1 %v756_v63, %s1182_s28  ;;  %v936_v63 = vld [vmem:[%s1493_s4] sm:$0xff] }
 0x22d   : > { %721 = vrot.lane.b32.xlu0 %v769_v43, %s1188_s24 }
 0x22f   : > { %706 = vrot.lane.b32.xlu1 %v703_v2, %s1181_s27 }
 0x231   : > { %708 = vrot.lane.b32.xlu0 %v700_v3, %s1181_s27 }
 0x233   : > { %704 = vrot.lane.b32.xlu1 %v699_v62, %s1181_s27 }
 0x235   : > { %958 = vperm.xlu0 %1153, %v955_v4  }
 0x27d   : > { %v889_v11 = vpop.permute.xlu1 %888 }
 0x27f   : > { %v925_v10 = vpop.permute.xlu0 %924 }
 0x283   : > { %v872_v12 = vpop.permute.xlu0 %871 }
 0x285   : > { %v726_v13 = vpop.permute.xlu1 %725 }
 0x287   : > { %v794_v14 = vpop.permute.xlu0 %793 }
 0x289   : > { %v891_v15 = vpop.permute.xlu1 %890 }
 0x28a   : > { %v894_v16 = vsel %vm495_vm6, %v889_v11, %v891_v15  ;;  %v895_v17 = vsel %vm495_vm6, %v891_v15, %v893_v1 }
 0x28b   : > { %v762_v18 = vpop.permute.xlu0 %761  ;;  %898 = vst [vmem:[#allocation5 + $0x30] sm:$0xf] %v894_v16  ;;  %899 = vst [vmem:[#allocation5 + $0x18] sm:$0xf] %v895_v17 }
 0x28d   : > { %v836_v19 = vpop.permute.xlu1 %835 }
 0x28f   : > { %v724_v20 = vpop.permute.xlu0 %723 }
 0x290   : > { %v728_v21 = vsel %vm311_vm7, %v724_v20, %v726_v13 }
 0x291   : > { %732 = vst [vmem:[#allocation5 + $0x58] sm:$0xf] %v728_v21  ;;  %v798_v22 = vpop.permute.xlu1 %797 }
 0x292   : > { %v952_v39 = vld [vmem:[#allocation5 + $0x18] sm:$0xff]  ;;  %v951_v43 = vld [vmem:[#allocation5 + $0x30] sm:$0xff] }
 0x293   : > { %v927_v25 = vpop.permute.xlu0 %926 }
 0x294   : > { %v930_v26 = vsel %vm275_vm5, %v925_v10, %v927_v25  ;;  %v931_v27 = vsel %vm275_vm5, %v927_v25, %v929_v7 }
 0x295   : > { %934 = vst [vmem:[#allocation5 + $0x68] sm:$0xf] %v930_v26  ;;  %935 = vst [vmem:[#allocation5 + $0x60] sm:$0xf] %v931_v27  ;;  %v758_v28 = vpop.permute.xlu1 %757 }
 0x297   : > { %v874_v29 = vpop.permute.xlu0 %873 }
 0x298   : > { %v877_v30 = vsel %vm336_vm4, %v872_v12, %v874_v29  ;;  %v878_v31 = vsel %vm336_vm4, %v874_v29, %v876_v9  ;;  %v940_v60 = vld [vmem:[#allocation5 + $0x58] sm:$0xff] }
 0x299   : > { %881 = vst [vmem:[#allocation5 + $0x10] sm:$0xf] %v877_v30  ;;  %882 = vst [vmem:[#allocation5 + $0x48] sm:$0xf] %v878_v31  ;;  %v838_v32 = vpop.permute.xlu1 %837 }
 0x29a   : > { %v841_v33 = vsel %vm377_vm3, %v836_v19, %v838_v32  ;;  %v842_v34 = vsel %vm377_vm3, %v838_v32, %v840_v8 }
 0x29b   : > { %v796_v35 = vpop.permute.xlu0 %795  ;;  %845 = vst [vmem:[#allocation5 + $0x50] sm:$0xf] %v841_v33  ;;  %846 = vst [vmem:[#allocation5 + $0x28] sm:$0xf] %v842_v34 }
 0x29c   : > { %v799_v36 = vsel %vm394_vm2, %v794_v14, %v796_v35  ;;  %v800_v5 = vsel %vm394_vm2, %v796_v35, %v798_v22  ;;  %v954_v37 = vld [vmem:[#allocation5 + $0x60] sm:$0xff]  ;;  %v953_v6 = vld [vmem:[#allocation5 + $0x68] sm:$0xff] }
 0x29d   : > { %803 = vst [vmem:[#allocation5 + $0x70] sm:$0xf] %v799_v36  ;;  %804 = vst [vmem:[#allocation5 + $0x80] sm:$0xf] %v800_v5  ;;  %978 = vmatprep.subr.mxu1 %v954_v37  ;;  %v760_v38 = vpop.permute.xlu1 %759 }
 0x29e   : > { %979 = vmatpush1.msra.mxu1 %v953_v6  ;;  %v763_v40 = vsel %vm353_vm1, %v758_v28, %v760_v38  ;;  %v764_v41 = vsel %vm353_vm1, %v760_v38, %v762_v18 }
 0x29f   : > { %v722_v42 = vpop.permute.xlu0 %721  ;;  %980 = vmatprep.subr.mxu1 %v952_v39  ;;  %767 = vst [vmem:[#allocation5 + $0x20] sm:$0xf] %v763_v40  ;;  %768 = vst [vmem:[#allocation5 + $0x8] sm:$0xf] %v764_v41 }
 0x2a0   : > { %v727_v44 = vsel %vm311_vm7, %v722_v42, %v724_v20  ;;  %981 = vmatpush1.msra.mxu1 %v951_v43  ;;  %v950_v45 = vld [vmem:[#allocation5 + $0x48] sm:$0xff]  ;;  %v949_v46 = vld [vmem:[#allocation5 + $0x10] sm:$0xff] }
 0x2a1   : > { %731 = vst [vmem:[#allocation5 + $0x78] sm:$0xf] %v727_v44  ;;  %982 = vmatprep.subr.mxu1 %v950_v45  ;;  %v707_v47 = vpop.permute.xlu1 %706 }
 0x2a2   : > { %983 = vmatpush1.msra.mxu1 %v949_v46  ;;  %v948_v49 = vld [vmem:[#allocation5 + $0x28] sm:$0xff]  ;;  %v947_v50 = vld [vmem:[#allocation5 + $0x50] sm:$0xff] }
 0x2a3   : > { %v709_v48 = vpop.permute.xlu0 %708  ;;  %984 = vmatprep.subr.mxu1 %v948_v49 }
 0x2a4   : > { %v711_v51 = vsel %vm292_vm0, %v707_v47, %v709_v48  ;;  %985 = vmatpush1.msra.mxu1 %v947_v50  ;;  %v944_v56 = vld [vmem:[#allocation5 + $0x80] sm:$0xff]  ;;  %v943_v57 = vld [vmem:[#allocation5 + $0x70] sm:$0xff] }
 0x2a5   : > { %715 = vst [vmem:[#allocation5 + $0x38] sm:$0xf] %v711_v51  ;;  %v705_v53 = vpop.permute.xlu1 %704  ;;  %986 = vmatprep.subr.mxu1 %v946_v52 }
 0x2a6   : > { %v710_v55 = vsel %vm292_vm0, %v705_v53, %v707_v47  ;;  %987 = vmatpush1.msra.mxu1 %v945_v54  ;;  %v942_v58 = vld [vmem:[#allocation5 + $0x8] sm:$0xff]  ;;  %v941_v59 = vld [vmem:[#allocation5 + $0x20] sm:$0xff] }
 0x2a7   : > { %714 = vst [vmem:[#allocation5] sm:$0xf] %v710_v55  ;;  %988 = vmatprep.subr.mxu1 %v944_v56 }
 0x2a8   : > { %989 = vmatpush1.msra.mxu1 %v943_v57  ;;  %v939_v61 = vld [vmem:[#allocation5 + $0x78] sm:$0xff] }
 0x2a9   : > { %990 = vmatprep.subr.mxu1 %v942_v58 }
 0x2aa   : > { %991 = vmatpush1.msra.mxu1 %v941_v59 }
 0x2ab   : > { %992 = vmatprep.subr.mxu1 %v940_v60 }
 0x2ac   : > { %v938_v62 = vld [vmem:[#allocation5 + $0x38] sm:$0xff]  ;;  %993 = vmatpush1.msra.mxu1 %v939_v61 }
 0x2ad   : > { %994 = vmatprep.subr.mxu1 %v938_v62 }
 0x2ae   : > { %v937_v0 = vld [vmem:[#allocation5] sm:$0xff] }
 0x2af   : > { %995 = vmatpush1.msra.mxu1 %v937_v0 }
 0x2b0   : > { %1128 = vmatmul.mubr.msk.f32.vlgmr.msra.gmra.mxu1 %vm566_vm8, %v936_v63  ;;  %v959_v2 = vpop.permute.xlu0 %958 }
 0x370   : > { %v1030_v3 = vpop.f32.mrf.mxu1 }
 0x371   : > { %v1031_v4 = vadd.f32 %v1030_v3, %v959_v2 }
 0x372   : > { %v1032_v1 = vpop.f32.mrf.mxu1 }
 0x373   : > { %v1129_v7 = vmul.f32 -1.442695, %v1031_v4  ;;  %v1033_v8 = vadd.f32 %v1032_v1, %v959_v2 }
 0x375   : > { %1163 = vpow2.f32 %v1129_v7  ;;  %v1130_v9 = vmul.f32 -1.442695, %v1033_v8 }
 0x377   : > { %1165 = vpow2.f32 %v1130_v9 }
 0x382   : > { %v1164_v10 = vpop.eup %1163 }
 0x383   : > { %v1041_v11 = vadd.f32 1.0, %v1164_v10 }
 0x384   : > { %v1166_v12 = vpop.eup %1165 }
 0x385   : > { %1167 = vrcp.f32 %v1041_v11  ;;  %v1042_v13 = vadd.f32 1.0, %v1166_v12 }
 0x387   : > { %1169 = vrcp.f32 %v1042_v13 }
 0x392   : > { %v1168_v14 = vpop.eup %1167 }
 0x393   : > { %v1047_v15 = vmul.f32 %v1168_v14, %v1031_v4 }
 0x394   : > { %v1170_v16 = vpop.eup %1169 }
 0x395   : > { %v1051_v17 = vadd.f32 %v1047_v15, %v1319_v24  ;;  %v1048_v18 = vmul.f32 %v1170_v16, %v1033_v8 }
 0x397   : > { %1053 = vst [vmem:[%s251_s23] sm:$0xff] %v1051_v17  ;;  %v1052_v19 = vadd.f32 %v1048_v18, %v1313_v23 }
 0x399   : > { %1054 = vst [vmem:[%s251_s23 + $0x8] sm:$0xff] %v1052_v19 }
 0x39a PF: > { %s16_s21 = sadd.s32 1, %s1178_s21  }
 0x39b   : > { %p13_p4 = scmp.ge.s32.totalorder %s16_s21, 4  }
 0x39d   :  { %15 = sbr.rel (!%p13_p4) target bundleno = 1 (0x1), region = 75 }

</bundles_post_ra>
